<compile_context>
chip_gen: v7x
topology: tpu7x:2x2x1
jax: 0.10.0
libtpu: 0.0.40
codegen_flags: <defaults>
</compile_context>

<pallas_src>
import functools

import jax
import jax.numpy as jnp
import numpy as np
from jax.experimental import pallas as pl
from jax.experimental.pallas import tpu as pltpu


def _round_up(x, m):
    return (x + m - 1) // m * m


# ----------------------------- Pallas kernel -------------------------------
def _overall_kernel(xr_ref, basis_ref, w1_ref, b1_ref, w2_ref, b2_ref, out_ref,
                    *, tn, hop, f_pad):
    # xr_ref   : (1, R_pad, hop)   zero-padded hop-strided audio rows of this batch
    # basis_ref: (2*hop, 2*f_pad)  window-folded [cos | -sin] real-DFT basis (cols padded)
    # w1_ref   : (f_pad, H_pad), b1_ref: (1, H_pad)
    # w2_ref   : (1, H_pad),     b2_ref: (1, 1)
    # out_ref  : (1, tn, 1)
    row0 = pl.multiple_of(pl.program_id(1) * tn, 8)

    # Frame i = concat(audio_row[i], audio_row[i+1])  (n_fft == 2*hop).  Instead of
    # materializing overlapping frames, contract the two halves separately (split-K).
    a = xr_ref[0, pl.ds(row0, tn), :]        # (tn, hop)  first half of every frame
    b = xr_ref[0, pl.ds(row0 + 1, tn), :]    # (tn, hop)  second half (one-row shift)

    basis_top = basis_ref[pl.ds(0, hop), :]      # (hop, 2*f_pad), window folded in
    basis_bot = basis_ref[pl.ds(hop, hop), :]    # (hop, 2*f_pad)
    z = (jnp.dot(a, basis_top, preferred_element_type=jnp.float32) +
         jnp.dot(b, basis_bot, preferred_element_type=jnp.float32))   # (tn, 2*f_pad)

    re = z[:, :f_pad]
    im = z[:, f_pad:]
    spec = re * re + im * im                 # power=2.0 spectrogram, (tn, f_pad)

    # Pointwise Conv1d(F->H) + ReLU (K and N dims lane-padded to 128).
    h = jnp.dot(spec, w1_ref[...], preferred_element_type=jnp.float32) + b1_ref[...]
    h = jnp.maximum(h, 0.0)                  # (tn, H_pad)

    # Pointwise Conv1d(H->1): keep the 1-wide output off the MXU (VPU mul + lane reduce).
    o = jnp.sum(h * w2_ref[...], axis=-1, keepdims=True) + b2_ref[...]   # (tn, 1)
    out_ref[0] = o


# ------------------------------- wrapper ------------------------------------
@functools.partial(jax.jit, static_argnames=("n_fft", "hop"))
def overall_model_forward(x, window, dft_cos, dft_sin, w1, b1, w2, b2,
                          *, n_fft, hop):
    """x: (B, T) float32 raw audio  ->  (B, N_frames) float32."""
    B, T = x.shape
    if n_fft != 2 * hop or T % hop != 0:
        # TODO(synk): general n_fft/hop ratios would need a gathered-frame path.
        raise ValueError("kernel assumes n_fft == 2*hop and T % hop == 0")

    R = T // hop
    N = R - 1                       # == (T - n_fft) // hop + 1
    F = n_fft // 2 + 1
    H = w1.shape[1]
    F_pad = _round_up(F, 128)
    H_pad = _round_up(H, 128)

    TN = min(256, _round_up(N, 8))  # frame-row tile (multiple of 8 sublanes)
    NT = -(-N // TN)
    N_pad = NT * TN
    R_pad = N_pad + 1

    # hop-strided audio rows; zero-pad so tail frames of the padded tile are valid
    # (their outputs are discarded below).
    xr = jnp.pad(x.reshape(B, R, hop), ((0, 0), (0, R_pad - R), (0, 0)))

    # Fold the Hann window into the DFT basis, pad F->F_pad, fuse cos|(-sin) into one RHS.
    cosb = jnp.pad(dft_cos, ((0, 0), (0, F_pad - F)))
    sinb = jnp.pad(dft_sin, ((0, 0), (0, F_pad - F)))
    basis = window.reshape(n_fft, 1) * jnp.concatenate([cosb, sinb], axis=1)  # (n_fft, 2*F_pad)

    w1_p = jnp.pad(w1, ((0, F_pad - F), (0, H_pad - H)))     # (F_pad, H_pad)
    b1_p = jnp.pad(b1, ((0, 0), (0, H_pad - H)))             # (1, H_pad)
    w2_row = jnp.pad(w2.T, ((0, 0), (0, H_pad - H)))         # (1, H_pad)

    kernel = functools.partial(_overall_kernel, tn=TN, hop=hop, f_pad=F_pad)

    out = pl.pallas_call(
        kernel,
        out_shape=jax.ShapeDtypeStruct((B, N_pad, 1), jnp.float32),
        grid_spec=pl.GridSpec(
            grid=(B, NT),
            in_specs=[
                pl.BlockSpec((1, R_pad, hop), lambda b, r: (b, 0, 0)),   # audio (resident per batch)
                pl.BlockSpec((n_fft, 2 * F_pad), lambda b, r: (0, 0)),   # fused windowed DFT basis
                pl.BlockSpec((F_pad, H_pad), lambda b, r: (0, 0)),       # conv1 weight
                pl.BlockSpec((1, H_pad), lambda b, r: (0, 0)),           # conv1 bias
                pl.BlockSpec((1, H_pad), lambda b, r: (0, 0)),           # conv2 weight (row)
                pl.BlockSpec((1, 1), lambda b, r: (0, 0)),               # conv2 bias
            ],
            out_specs=pl.BlockSpec((1, TN, 1), lambda b, r: (b, r, 0)),
        ),
        compiler_params=pltpu.CompilerParams(
            dimension_semantics=("parallel", "parallel")),
    )(xr, basis, w1_p, b1_p, w2_row, b2)

    # model output is (B, 1, N); torch.squeeze(dim=1) -> (B, N)
    return out[:, :N, 0]


# --------------------------- parameter construction -------------------------
def make_params(n_fft, hidden, key):
    F = n_fft // 2 + 1
    # Hann window (periodic, like torch.hann_window default).
    n = np.arange(n_fft)
    window = (0.5 * (1.0 - np.cos(2.0 * np.pi * n / n_fft))).astype(np.float32)[None, :]

    # Real-DFT bases: X[k] = sum_n x[n] * exp(-2i*pi*n*k/n_fft), k = 0..n_fft//2
    k = np.arange(F)
    ang = 2.0 * np.pi * np.outer(n, k) / n_fft                     # (n_fft, F)
    dft_cos = np.cos(ang).astype(np.float32)
    dft_sin = (-np.sin(ang)).astype(np.float32)

    k1, k2, k3, k4 = jax.random.split(key, 4)
    w1 = (jax.random.normal(k1, (F, hidden), jnp.float32) * 0.05)
    b1 = (jax.random.normal(k2, (1, hidden), jnp.float32) * 0.01)
    w2 = (jax.random.normal(k3, (hidden, 1), jnp.float32) * 0.05)
    b2 = (jax.random.normal(k4, (1, 1), jnp.float32) * 0.01)
    return (jnp.asarray(window), jnp.asarray(dft_cos), jnp.asarray(dft_sin),
            w1, b1, w2, b2)


# ------------------------------ reference (JAX) ------------------------------
def reference_forward(x, window, dft_cos, dft_sin, w1, b1, w2, b2, *, n_fft, hop):
    B, T = x.shape
    N = (T - n_fft) // hop + 1
    idx = jnp.arange(N)[:, None] * hop + jnp.arange(n_fft)[None, :]
    frames = x[:, idx] * window[None]                               # (B, N, n_fft)
    re = frames @ dft_cos
    im = frames @ dft_sin
    spec = re * re + im * im                                        # (B, N, F)
    h = jnp.maximum(spec @ w1 + b1, 0.0)                            # (B, N, H)
    o = h @ w2 + b2                                                 # (B, N, 1)
    return o[..., 0]                                                # (B, N)


if __name__ == "__main__":
    B, T = 2, 1024
    n_fft, hop, hidden = 128, 64, 32

    key = jax.random.PRNGKey(0)
    kx, kp = jax.random.split(key)
    x = jax.random.normal(kx, (B, T), jnp.float32)
    params = make_params(n_fft, hidden, kp)

    out = overall_model_forward(x, *params, n_fft=n_fft, hop=hop)
    out = jax.block_until_ready(out)

    ref = reference_forward(x, *params, n_fft=n_fft, hop=hop)
    np.testing.assert_allclose(np.asarray(out), np.asarray(ref), rtol=2e-4, atol=2e-4)

    print("KERNEL_OK")
</pallas_src>

<mosaic_0001>
module attributes {stable_mosaic.version = 11 : i64} {
  func.func @_overall_kernel(%arg0: i32, %arg1: i32, %arg2: memref<1x17x64xf32, #tpu.memory_space<vmem>>, %arg3: memref<128x256xf32, #tpu.memory_space<vmem>>, %arg4: memref<128x128xf32, #tpu.memory_space<vmem>>, %arg5: memref<1x128xf32, #tpu.memory_space<vmem>>, %arg6: memref<1x128xf32, #tpu.memory_space<vmem>>, %arg7: memref<1x1xf32, #tpu.memory_space<vmem>>, %arg8: memref<1x16x1xf32, #tpu.memory_space<vmem>>) attributes {dimension_semantics = [#tpu.dimension_semantics<parallel>, #tpu.dimension_semantics<parallel>], iteration_bounds = array<i64: 2, 1>, scalar_prefetch = 0 : i64, scratch_operands = 0 : i64, tpu.core_type = #tpu.core_type<tc>, window_params = [{transform_indices = @transform_0, window_bounds = array<i64: 1, 17, 64>}, {pipeline_mode = #tpu.pipeline_mode<synchronous>, transform_indices = @transform_1, window_bounds = array<i64: 128, 256>}, {pipeline_mode = #tpu.pipeline_mode<synchronous>, transform_indices = @transform_2, window_bounds = array<i64: 128, 128>}, {pipeline_mode = #tpu.pipeline_mode<synchronous>, transform_indices = @transform_3, window_bounds = array<i64: 1, 128>}, {pipeline_mode = #tpu.pipeline_mode<synchronous>, transform_indices = @transform_4, window_bounds = array<i64: 1, 128>}, {pipeline_mode = #tpu.pipeline_mode<synchronous>, transform_indices = @transform_5, window_bounds = array<i64: 1, 1>}, {transform_indices = @transform_6, window_bounds = array<i64: 1, 16, 1>}]} {
    %c16_i32 = arith.constant 16 : i32
    %0 = arith.muli %arg1, %c16_i32 : i32
    %1 = tpu.assume_multiple %0, 8 : i32
    %c0 = arith.constant 0 : index
    %2 = arith.index_cast %1 : i32 to index
    %c0_0 = arith.constant 0 : index
    %3 = vector.load %arg2[%c0, %2, %c0_0] : memref<1x17x64xf32, #tpu.memory_space<vmem>>, vector<1x16x64xf32>
    %4 = vector.shape_cast %3 : vector<1x16x64xf32> to vector<16x64xf32>
    %c1_i32 = arith.constant 1 : i32
    %5 = arith.addi %1, %c1_i32 : i32
    %c0_1 = arith.constant 0 : index
    %6 = arith.index_cast %5 : i32 to index
    %c0_2 = arith.constant 0 : index
    %7 = vector.load %arg2[%c0_1, %6, %c0_2] : memref<1x17x64xf32, #tpu.memory_space<vmem>>, vector<1x16x64xf32>
    %8 = vector.shape_cast %7 : vector<1x16x64xf32> to vector<16x64xf32>
    %c0_3 = arith.constant 0 : index
    %c0_4 = arith.constant 0 : index
    %9 = vector.load %arg3[%c0_3, %c0_4] : memref<128x256xf32, #tpu.memory_space<vmem>>, vector<64x256xf32>
    %c64 = arith.constant 64 : index
    %c0_5 = arith.constant 0 : index
    %10 = vector.load %arg3[%c64, %c0_5] : memref<128x256xf32, #tpu.memory_space<vmem>>, vector<64x256xf32>
    %cst = arith.constant dense<0.000000e+00> : vector<16x256xf32>
    %11 = tpu.matmul %4, %9, %cst {dimension_numbers = #tpu.dot_dimension_numbers<[1], [0], [0], [1], [0, 0, 1, 1], [], []>} : vector<16x64xf32>, vector<64x256xf32>, vector<16x256xf32> -> vector<16x256xf32>
    %cst_6 = arith.constant dense<0.000000e+00> : vector<16x256xf32>
    %12 = tpu.matmul %8, %10, %cst_6 {dimension_numbers = #tpu.dot_dimension_numbers<[1], [0], [0], [1], [0, 0, 1, 1], [], []>} : vector<16x64xf32>, vector<64x256xf32>, vector<16x256xf32> -> vector<16x256xf32>
    %13 = arith.addf %11, %12 : vector<16x256xf32>
    %14 = vector.extract_strided_slice %13 {offsets = [0, 0], sizes = [16, 128], strides = [1, 1]} : vector<16x256xf32> to vector<16x128xf32>
    %15 = vector.extract_strided_slice %13 {offsets = [0, 128], sizes = [16, 128], strides = [1, 1]} : vector<16x256xf32> to vector<16x128xf32>
    %16 = arith.mulf %14, %14 : vector<16x128xf32>
    %17 = arith.mulf %15, %15 : vector<16x128xf32>
    %18 = arith.addf %16, %17 : vector<16x128xf32>
    %c0_7 = arith.constant 0 : index
    %c0_8 = arith.constant 0 : index
    %19 = vector.load %arg4[%c0_7, %c0_8] : memref<128x128xf32, #tpu.memory_space<vmem>>, vector<128x128xf32>
    %cst_9 = arith.constant dense<0.000000e+00> : vector<16x128xf32>
    %20 = tpu.matmul %18, %19, %cst_9 {dimension_numbers = #tpu.dot_dimension_numbers<[1], [0], [0], [1], [0, 0, 1, 1], [], []>} : vector<16x128xf32>, vector<128x128xf32>, vector<16x128xf32> -> vector<16x128xf32>
    %c0_10 = arith.constant 0 : index
    %c0_11 = arith.constant 0 : index
    %21 = vector.load %arg5[%c0_10, %c0_11] : memref<1x128xf32, #tpu.memory_space<vmem>>, vector<1x128xf32>
    %22 = vector.broadcast %21 : vector<1x128xf32> to vector<16x128xf32>
    %23 = arith.addf %20, %22 : vector<16x128xf32>
    %cst_12 = arith.constant 0.000000e+00 : f32
    %24 = vector.broadcast %cst_12 : f32 to vector<16x128xf32>
    %25 = arith.maximumf %23, %24 : vector<16x128xf32>
    %c0_13 = arith.constant 0 : index
    %c0_14 = arith.constant 0 : index
    %26 = vector.load %arg6[%c0_13, %c0_14] : memref<1x128xf32, #tpu.memory_space<vmem>>, vector<1x128xf32>
    %27 = vector.broadcast %26 : vector<1x128xf32> to vector<16x128xf32>
    %28 = arith.mulf %25, %27 : vector<16x128xf32>
    %cst_15 = arith.constant dense<0.000000e+00> : vector<16xf32>
    %29 = vector.multi_reduction <add>, %28, %cst_15 [1] : vector<16x128xf32> to vector<16xf32>
    %30 = vector.shape_cast %29 : vector<16xf32> to vector<16x1xf32>
    %c0_16 = arith.constant 0 : index
    %c0_17 = arith.constant 0 : index
    %31 = vector.load %arg7[%c0_16, %c0_17] : memref<1x1xf32, #tpu.memory_space<vmem>>, vector<1x1xf32>
    %32 = vector.broadcast %31 : vector<1x1xf32> to vector<16x1xf32>
    %33 = arith.addf %30, %32 : vector<16x1xf32>
    %c0_18 = arith.constant 0 : index
    %c0_19 = arith.constant 0 : index
    %c0_20 = arith.constant 0 : index
    %34 = vector.load %arg8[%c0_18, %c0_19, %c0_20] : memref<1x16x1xf32, #tpu.memory_space<vmem>>, vector<1x16x1xf32>
    %35 = vector.shape_cast %34 : vector<1x16x1xf32> to vector<16x1xf32>
    %36 = vector.shape_cast %33 : vector<16x1xf32> to vector<1x16x1xf32>
    tpu.vector_store %arg8[%c0_18, %c0_19, %c0_20], %36 {strides = array<i32>} : memref<1x16x1xf32, #tpu.memory_space<vmem>>, vector<1x16x1xf32>,
    return
  }
  func.func @transform_0(%arg0: i32, %arg1: i32) -> (i32, i32, i32) {
    %c0_i32 = arith.constant 0 : i32
    %c0_i32_0 = arith.constant 0 : i32
    %c0_i32_1 = arith.constant 0 : i32
    return %arg0, %c0_i32, %c0_i32_0 : i32, i32, i32
  }
  func.func @transform_1(%arg0: i32, %arg1: i32) -> (i32, i32) {
    %c0_i32 = arith.constant 0 : i32
    %c0_i32_0 = arith.constant 0 : i32
    %c0_i32_1 = arith.constant 0 : i32
    return %c0_i32, %c0_i32_0 : i32, i32
  }
  func.func @transform_2(%arg0: i32, %arg1: i32) -> (i32, i32) {
    %c0_i32 = arith.constant 0 : i32
    %c0_i32_0 = arith.constant 0 : i32
    %c0_i32_1 = arith.constant 0 : i32
    return %c0_i32, %c0_i32_0 : i32, i32
  }
  func.func @transform_3(%arg0: i32, %arg1: i32) -> (i32, i32) {
    %c0_i32 = arith.constant 0 : i32
    %c0_i32_0 = arith.constant 0 : i32
    %c0_i32_1 = arith.constant 0 : i32
    return %c0_i32, %c0_i32_0 : i32, i32
  }
  func.func @transform_4(%arg0: i32, %arg1: i32) -> (i32, i32) {
    %c0_i32 = arith.constant 0 : i32
    %c0_i32_0 = arith.constant 0 : i32
    %c0_i32_1 = arith.constant 0 : i32
    return %c0_i32, %c0_i32_0 : i32, i32
  }
  func.func @transform_5(%arg0: i32, %arg1: i32) -> (i32, i32) {
    %c0_i32 = arith.constant 0 : i32
    %c0_i32_0 = arith.constant 0 : i32
    %c0_i32_1 = arith.constant 0 : i32
    return %c0_i32, %c0_i32_0 : i32, i32
  }
  func.func @transform_6(%arg0: i32, %arg1: i32) -> (i32, i32, i32) {
    %c0_i32 = arith.constant 0 : i32
    %c0_i32_0 = arith.constant 0 : i32
    return %arg0, %arg1, %c0_i32 : i32, i32, i32
  }
}

</mosaic_0001>

<bundles_post_ra>
// kernel: overall_model_forward.1
= control target key start
LH: loop header
LB: loop body
LE: loop exit
PB: predicated region body
PF: predicated region fallthrough
CT: control target
= control target key end

     0   :  { %s931_s23 = smov 0   ;;  %s933_s24 = smov 0   ;;  %s1138_s0 = inlined_call_operand.vmem [shape: f32[2,17,64], index: 0, kind: input, shape index: {}]   ;;  %s1139_s1 = inlined_call_operand.vmem [shape: f32[128,256], index: 1, kind: input, shape index: {}]   ;;  %s1140_s2 = inlined_call_operand.vmem [shape: f32[128,128], index: 2, kind: input, shape index: {}]   ;;  %s1141_s3 = inlined_call_operand.vmem [shape: f32[1,128], index: 3, kind: input, shape index: {}]   ;;  %s1142_s4 = inlined_call_operand.vmem [shape: f32[1,128], index: 4, kind: input, shape index: {}]   ;;  %s1143_s5 = inlined_call_operand.<no memory space> [shape: f32[1,1], index: 5, kind: input, shape index: {}]   ;;  %s1144_s6 = inlined_call_operand.vmem [shape: f32[2,16,1], index: 6, kind: output, shape index: {}]  }
   0x1   :  { %v11_v0 = vstv %s1143_s5  ;;  %s935_s25 = smov 0  }
   0x2   :  { %12 = vst [vmem:[#allocation2] sm:$0x1] %v11_v0 }
   0x3 LB: > { %s30_s5 = sadd.s32 1, %s886_s24  ;;  %p705_p0 = scmp.ge.s32.totalorder %s890_s25, 1  ;;  %s890_s25 = sphi %s935_s25, %s18_s25   ;;  %s886_s24 = sphi %s933_s24, %s1146_s24   ;;  %s882_s23 = sphi %s931_s23, %s1145_s23  }
   0x4   : > { %p32_p1 = scmp.ge.s32.totalorder %s30_s5, 2  ;;  %p228_p2 = scmp.lt.s32.totalorder %s890_s25, 3 }
   0x6   : > { %s1148_s5 = smov (%p32_p1, %s30_s5), 0  ;;  %p229_p3 = pnand %p705_p0, %p228_p2 }
   0x7   : > { %v302_v1 = vld [vmem:[%s1139_s1 + $0x88] sm:$0xff] (!%p229_p3)  ;;  %v304_v2 = vld [vmem:[%s1139_s1 + $0x98] sm:$0xff] (!%p229_p3)  ;;  %v301_v3 = vld [vmem:[%s1139_s1 + $0x80] sm:$0xff] (!%p229_p3)  ;;  %v892_v8 = vmov (!%p229_p3), 0.0   ;;  %p262_p4 = scmp.lt.s32.totalorder (!%p229_p3), %s882_s23, 1  ;;  %vm317_vm0 = vcmask (!%p229_p3), 523264  }
   0x8   : > { %232 = sbr.rel (%p229_p3) target bundleno = 631 (0x277), region = 44  ;;  %v774_v4 = vpack.c.bf16 (!%p229_p3), %v304_v2, %v302_v1  ;;  %v303_v5 = vld [vmem:[%s1139_s1 + $0x90] sm:$0xff] (!%p229_p3)  ;;  %v306_v6 = vld [vmem:[%s1139_s1 + $0xa8] sm:$0xff] (!%p229_p3)  ;;  %v308_v7 = vld [vmem:[%s1139_s1 + $0xb8] sm:$0xff] (!%p229_p3)  ;;  %388 = vmatprep.mubr.f32.mxu0 (!%p229_p3), %v892_v8  ;;  %vm612_vm1 = vcmask (!%p229_p3), 7168  }
   0x9   : > { %v776_v9 = vpack.c.bf16 (!%p229_p3), %v303_v5, %v301_v3  ;;  %v778_v10 = vpack.c.bf16 (!%p229_p3), %v308_v7, %v306_v6  ;;  %v305_v11 = vld [vmem:[%s1139_s1 + $0xa0] sm:$0xff] (!%p229_p3)  ;;  %v307_v12 = vld [vmem:[%s1139_s1 + $0xb0] sm:$0xff] (!%p229_p3)  ;;  %v310_v13 = vld [vmem:[%s1139_s1 + $0xc8] sm:$0xff] (!%p229_p3) }
   0xa   : > { %775 = vmatprep.subr.bf16.mxu0 (!%p229_p3), %v774_v4  ;;  %v312_v14 = vld [vmem:[%s1139_s1 + $0xd8] sm:$0xff] (!%p229_p3)  ;;  %v780_v15 = vpack.c.bf16 (!%p229_p3), %v307_v12, %v305_v11  ;;  %v309_v17 = vld [vmem:[%s1139_s1 + $0xc0] sm:$0xff] (!%p229_p3)  ;;  %v311_v18 = vld [vmem:[%s1139_s1 + $0xd0] sm:$0xff] (!%p229_p3) }
   0xb   : > { %777 = vmatpush1.bf16.msra.mxu0 (!%p229_p3), %v776_v9  ;;  %v782_v16 = vpack.c.bf16 (!%p229_p3), %v312_v14, %v310_v13  ;;  %v314_v19 = vld [vmem:[%s1139_s1 + $0xe8] sm:$0xff] (!%p229_p3)  ;;  %v316_v20 = vld [vmem:[%s1139_s1 + $0xf8] sm:$0xff] (!%p229_p3)  ;;  %v784_v21 = vpack.c.bf16 (!%p229_p3), %v311_v18, %v309_v17  ;;  %v313_v23 = vld [vmem:[%s1139_s1 + $0xe0] sm:$0xff] (!%p229_p3) }
   0xc   : > { %779 = vmatprep.subr.bf16.mxu0 (!%p229_p3), %v778_v10  ;;  %v786_v22 = vpack.c.bf16 (!%p229_p3), %v316_v20, %v314_v19  ;;  %v315_v24 = vld [vmem:[%s1139_s1 + $0xf0] sm:$0xff] (!%p229_p3)  ;;  %v286_v25 = vld [vmem:[%s1139_s1 + $0x8] sm:$0xff] (!%p229_p3)  ;;  %v288_v26 = vld [vmem:[%s1139_s1 + $0x18] sm:$0xff] (!%p229_p3) }
   0xd   : > { %v788_v27 = vpack.c.bf16 (!%p229_p3), %v315_v24, %v313_v23  ;;  %v490_v28 = vld [vmem:[%s1140_s2] sm:$0xff] (!%p229_p3)  ;;  %v491_v29 = vld [vmem:[%s1140_s2 + $0x8] sm:$0xff] (!%p229_p3)  ;;  %v492_v30 = vld [vmem:[%s1140_s2 + $0x10] sm:$0xff] (!%p229_p3)  ;;  %v790_v31 = vpack.c.bf16 (!%p229_p3), %v288_v26, %v286_v25 }
   0xe   : > { %v285_v32 = vld [vmem:[%s1139_s1] sm:$0xff] (!%p229_p3)  ;;  %v287_v33 = vld [vmem:[%s1139_s1 + $0x10] sm:$0xff] (!%p229_p3)  ;;  %v806_v34 = vpack.c.bf16 (!%p229_p3), %v491_v29, %v490_v28  ;;  %v493_v35 = vld [vmem:[%s1140_s2 + $0x18] sm:$0xff] (!%p229_p3) }
   0xf   : > { %s1150_s23 = smov (!%p262_p4, %s882_s23), 1  ;;  %781 = vmatpush1.bf16.msra.mxu0 %v780_v15  ;;  %v290_v36 = vld [vmem:[%s1139_s1 + $0x28] sm:$0xff]  ;;  %v292_v37 = vld [vmem:[%s1139_s1 + $0x38] sm:$0xff]  ;;  %v810_v38 = vpack.c.bf16 %v493_v35, %v492_v30  ;;  %v494_v39 = vld [vmem:[%s1140_s2 + $0x20] sm:$0xff]  ;;  %v792_v42 = vpack.c.bf16 %v287_v33, %v285_v32 }
  0x10   : > { %783 = vmatprep.subr.bf16.mxu0 %v782_v16  ;;  %s842_s13 = smul.u32 24, %s1150_s23  ;;  %807 = vmatprep.subr.bf16.mxu1 %v806_v34  ;;  %v495_v40 = vld [vmem:[%s1140_s2 + $0x28] sm:$0xff]  ;;  %v794_v43 = vpack.c.bf16 %v292_v37, %v290_v36  ;;  %v289_v44 = vld [vmem:[%s1139_s1 + $0x20] sm:$0xff]  ;;  %v291_v45 = vld [vmem:[%s1139_s1 + $0x30] sm:$0xff]  ;;  %s720_s26 = sshll.u32 %s1150_s23, 4 }
  0x11   : > { %809 = vmatpush3.bf16.msra.mxu1 %v806_v34  ;;  %v294_v46 = vld [vmem:[%s1139_s1 + $0x48] sm:$0xff]  ;;  %v296_v47 = vld [vmem:[%s1139_s1 + $0x58] sm:$0xff]  ;;  %v814_v48 = vpack.c.bf16 %v495_v40, %v494_v39  ;;  %v496_v49 = vld [vmem:[%s1140_s2 + $0x30] sm:$0xff]  ;;  %v796_v51 = vpack.c.bf16 %v291_v45, %v289_v44  ;;  %s275_s30 = scalar_lea.vmem %s1144_s6, %s720_s26 }
  0x12   : > { %s1025_s29 = scalar_lea.vmem %s1138_s0, %s842_s13  ;;  %811 = vmatprep.subr.bf16.mxu1 %v810_v38  ;;  %v497_v50 = vld [vmem:[%s1140_s2 + $0x38] sm:$0xff]  ;;  %v798_v53 = vpack.c.bf16 %v296_v47, %v294_v46  ;;  %v293_v54 = vld [vmem:[%s1139_s1 + $0x40] sm:$0xff]  ;;  %v295_v55 = vld [vmem:[%s1139_s1 + $0x50] sm:$0xff] }
  0x13   : > { %785 = vmatpush1.bf16.msra.mxu0 %v784_v21  ;;  %v709_v41 = vld [vmem:[%s1025_s29 + $0x1] sm:$0xff]  ;;  %v710_v52 = vld [vmem:[%s1025_s29 + $0x9] sm:$0xff]  ;;  %v300_v57 = vld [vmem:[%s1139_s1 + $0x78] sm:$0xff]  ;;  %v818_v58 = vpack.c.bf16 %v497_v50, %v496_v49  ;;  %v800_v61 = vpack.c.bf16 %v295_v55, %v293_v54 }
  0x14   : > { %787 = vmatprep.subr.bf16.mxu0 %v786_v22  ;;  %v298_v56 = vld [vmem:[%s1139_s1 + $0x68] sm:$0xff]  ;;  %v498_v59 = vld [vmem:[%s1140_s2 + $0x40] sm:$0xff]  ;;  %v299_v0 = vld [vmem:[%s1139_s1 + $0x70] sm:$0xff] }
  0x15   : > { %813 = vmatpush3.bf16.msra.mxu1 %v810_v38  ;;  %v499_v60 = vld [vmem:[%s1140_s2 + $0x48] sm:$0xff]  ;;  %v802_v62 = vpack.c.bf16 %v300_v57, %v298_v56  ;;  %v297_v63 = vld [vmem:[%s1139_s1 + $0x60] sm:$0xff]  ;;  %v500_v2 = vld [vmem:[%s1140_s2 + $0x50] sm:$0xff] }
  0x16   : > { %815 = vmatprep.subr.bf16.mxu1 %v814_v48  ;;  %v822_v1 = vpack.c.bf16 %v499_v60, %v498_v59  ;;  %v501_v3 = vld [vmem:[%s1140_s2 + $0x58] sm:$0xff]  ;;  %v804_v4 = vpack.c.bf16 %v299_v0, %v297_v63  ;;  %v279_v6 = vld [vmem:[%s1025_s29] sm:$0xff]  ;;  %v280_v7 = vld [vmem:[%s1025_s29 + $0x8] sm:$0xff] }
  0x17   : > { %789 = vmatpush1.bf16.msra.mxu0 %v788_v27  ;;  %v826_v5 = vpack.c.bf16 %v501_v3, %v500_v2  ;;  %v502_v9 = vld [vmem:[%s1140_s2 + $0x60] sm:$0xff]  ;;  %v503_v10 = vld [vmem:[%s1140_s2 + $0x68] sm:$0xff]  ;;  %v504_v12 = vld [vmem:[%s1140_s2 + $0x70] sm:$0xff] }
  0x18   : > { %791 = vmatprep.subr.bf16.mxu0 %v790_v31  ;;  %v830_v11 = vpack.c.bf16 %v503_v10, %v502_v9  ;;  %v715_v24 = vld [vmem:[%s1141_s3] ss:$0 sm:$0xff] }
  0x19   : > { %817 = vmatpush3.bf16.msra.mxu1 %v814_v48  ;;  %v716_v29 = vld [vmem:[%s1142_s4] ss:$0 sm:$0xff] }
  0x1a   : > { %711 = vmatmul.mubr.msk.f32.vlgmr.msra.gmra.mrb[0].mxu0 %vm317_vm0, %v709_v41  ;;  %819 = vmatprep.subr.bf16.mxu1 %v818_v58  ;;  %v717_v34 = vld [vmem:[#allocation2] ss:$0 sm:$0xff] }
  0x1b   : > { %793 = vmatpush1.bf16.msra.mxu0 %v792_v42  ;;  %394 = vmatprep.mubr.f32.mxu0 %v892_v8 }
  0x1c   : > { %795 = vmatprep.subr.bf16.mxu0 %v794_v43 }
  0x1d   : > { %821 = vmatpush3.bf16.msra.mxu1 %v818_v58 }
  0x1e   : > { %712 = vmatmul.mubr.msk.f32.gmra.mrb[2].mxu0 %vm317_vm0, %v710_v52  ;;  %823 = vmatprep.subr.bf16.mxu1 %v822_v1 }
  0x1f   : > { %797 = vmatpush1.bf16.msra.mxu0 %v796_v51  ;;  %471 = vmatprep.mubr.f32.mxu0 %v892_v8 }
  0x20   : > { %799 = vmatprep.subr.bf16.mxu0 %v798_v53 }
  0x21   : > { %825 = vmatpush3.bf16.msra.mxu1 %v822_v1 }
  0x22   : > { %827 = vmatprep.subr.bf16.mxu1 %v826_v5 }
  0x23   : > { %801 = vmatpush1.bf16.msra.mxu0 %v800_v61 }
  0x24   : > { %803 = vmatprep.subr.bf16.mxu0 %v802_v62 }
  0x25   : > { %829 = vmatpush3.bf16.msra.mxu1 %v826_v5 }
  0x26   : > { %831 = vmatprep.subr.bf16.mxu1 %v830_v11 }
  0x27   : > { %805 = vmatpush1.bf16.msra.mxu0 %v804_v4 }
  0x29   : > { %833 = vmatpush3.bf16.msra.mxu1 %v830_v11 }
  0x2a   : > { %713 = vmatmul.mubr.msk.f32.vlgmr.msra.gmra.mrb[0].mxu0 %vm317_vm0, %v279_v6 }
  0x2b   : > { %477 = vmatprep.mubr.f32.mxu0 %v892_v8  ;;  %v505_v8 = vld [vmem:[%s1140_s2 + $0x78] sm:$0xff] }
  0x2c   : > { %v834_v13 = vpack.c.bf16 %v505_v8, %v504_v12 }
  0x2e   : > { %714 = vmatmul.mubr.msk.f32.gmra.mrb[2].mxu0 %vm317_vm0, %v280_v7  ;;  %835 = vmatprep.subr.bf16.mxu1 %v834_v13 }
  0x2f   : > { %837 = vmatpush3.bf16.msra.mxu1 %v834_v13 }
  0xfd   : > { %v473_v14 = vpop.f32.mrb[0].mxu0 }
  0xfe   : > { %v484_v15 = vmul.f32 %v473_v14, %v473_v14  ;;  %v475_v16 = vpop.f32.mrb[1].mxu0 }
  0xff   : > { %v486_v17 = vmul.f32 %v475_v16, %v475_v16 }
 0x101   : > { %v479_v18 = vpop.f32.mrb[2].mxu0  ;;  %v488_v19 = vadd.f32 %v486_v17, %v484_v15 }
 0x102   : > { %v485_v20 = vmul.f32 %v479_v18, %v479_v18  ;;  %v481_v21 = vpop.f32.mrb[3].mxu0 }
 0x103   : > { %v487_v22 = vmul.f32 %v481_v21, %v481_v21  ;;  %771 = vmatprep.mubr.f32.mxu1 %v488_v19 }
 0x105   : > { %v489_v23 = vadd.f32 %v487_v22, %v485_v20 }
 0x107   : > { %772 = vmatmul.mubr.f32.vlgmr.msra.gmra.mrb[0].mxu1 %v489_v23 }
 0x1da   : > { %v773_v25 = vpop.f32.mrb[0].mxu1 }
 0x1db   : > { %v579_v26 = vpop.f32.mrb[1].mxu1  ;;  %v585_v27 = vadd.f32 %v773_v25, %v715_v24 }
 0x1dc   : > { %v580_v28 = vadd.f32 %v715_v24, %v579_v26 }
 0x1dd   : > { %v589_v31 = vmax.f32 %v585_v27, 0.0 }
 0x1de   : > { %v588_v30 = vmax.f32 %v580_v28, 0.0 }
 0x1df   : > { %v598_v33 = vmul.f32 %v716_v29, %v589_v31 }
 0x1e0   : > { %v597_v32 = vmul.f32 %v716_v29, %v588_v30 }
 0x1e2   : > { %599 = vadd.xlane.f32.xlu0 %v597_v32 }
 0x1e6   : > { %601 = vadd.xlane.f32.xlu0 %v598_v33 }
 0x26f   : > { %v600_v35 = vpop.xlane.xlu0 %599 }
 0x270   : > { %v610_v36 = vadd.f32 %v717_v34, %v600_v35 }
 0x272   : > { %613 = vst.msk [vmem:[%s275_s30] sm:$0xff] %vm612_vm1, %v610_v36 }
 0x273   : > { %v602_v37 = vpop.xlane.xlu0 %601 }
 0x274   : > { %v611_v38 = vadd.f32 %v717_v34, %v602_v37 }
 0x276   : > { %614 = vst.msk [vmem:[%s275_s30 + $0x8] sm:$0xff] %vm612_vm1, %v611_v38 }
 0x277 PF: > { %s18_s25 = sadd.s32 1, %s890_s25   ;;  %s1145_s23 = smov %s886_s24 }
 0x278   : > { %p15_p5 = scmp.ge.s32.totalorder %s18_s25, 4   ;;  %s1146_s24 = smov %s1148_s5 }
 0x27a   :  { %17 = sbr.rel (!%p15_p5) target bundleno = 3 (0x3), region = 76 }

</bundles_post_ra>
